<compile_context>
chip_gen: v6e
topology: v6e:2x2x1
jax: 0.10.0
libtpu: 0.0.40
codegen_flags: <defaults>
</compile_context>

<pallas_src>
import functools

import jax
import jax.numpy as jnp
from jax import lax
from jax.experimental import pallas as pl
from jax.experimental.pallas import tpu as pltpu

_LANE = 128


def _chip_config():
    """Trace-time chip query -> (num_tensorcores, max_block_rows)."""
    kind = ""
    try:
        kind = jax.devices()[0].device_kind.lower()
    except Exception:
        pass
    is_v7 = ("v7" in kind) or ("7x" in kind)
    num_cores = 2 if is_v7 else 1          # v7x: 2 TCs/chip; v5e/v6e: 1
    max_rows = 4096 if is_v7 else 2048     # 2 MiB vs 1 MiB f32 blocks
    return num_cores, max_rows


_NUM_CORES, _MAX_BLOCK_ROWS = _chip_config()


def _split_lane_rows(x):
    """Return ((rows, 128) lane-aligned prefix, <128-element tail).

    No pad copy: in the common numel % 128 == 0 case this is a pure reshape;
    otherwise the tail is a tiny slice reduced wrapper-side."""
    flat = x.reshape(-1)
    n = flat.shape[0]
    n_main = (n // _LANE) * _LANE
    main = flat[:n_main].reshape(-1, _LANE)
    tail = flat[n_main:]
    return main, tail


def _acc_rows(br):
    # vreg-sized (8, 128) accumulator when the block is a whole number of
    # sublane groups; otherwise (tiny single-block stream) keep block shape.
    return 8 if (br % 8 == 0 and br >= 8) else br


def _plan(rows):
    br = rows if rows <= _MAX_BLOCK_ROWS else _MAX_BLOCK_ROWS
    s = pl.cdiv(rows, br)            # total row-blocks in the stream
    sc = pl.cdiv(s, _NUM_CORES)      # row-blocks per core
    return br, s, sc


def _ae_loss_kernel(r_ref, t_ref, p_ref, rec_out_ref, kl_out_ref, *,
                    rec_rows, post_rows, br_rec, br_post,
                    s_rec, s_post, sc_rec, sc_post):
    c = pl.program_id(0)             # TensorCore split (CORE_PARALLEL on v7x)
    i = pl.program_id(1)             # sequential reduction step within a core

    # Output blocks stay resident across i (constant block index): they ARE
    # the accumulators.  Zero them on each core's first step.
    @pl.when(i == 0)
    def _init():
        rec_out_ref[...] = jnp.zeros_like(rec_out_ref)
        kl_out_ref[...] = jnp.zeros_like(kl_out_ref)

    rec_blk = c * sc_rec + i
    post_blk = c * sc_post + i

    @pl.when(jnp.logical_and(i < sc_rec, rec_blk < s_rec))
    def _rec():
        d = r_ref[...].astype(jnp.float32) - t_ref[...].astype(jnp.float32)
        if rec_rows % br_rec != 0:   # static: stream has a partial last block
            row = lax.broadcasted_iota(jnp.int32, d.shape, 0) + rec_blk * br_rec
            d = jnp.where(row < rec_rows, d, 0.0)
        sq = d * d
        if br_rec % 8 == 0 and br_rec > 8:
            # Tile-aligned reshape: pure VPU vreg adds, no XLU per step.
            sq = jnp.sum(sq.reshape(br_rec // 8, 8, _LANE), axis=0)
        rec_out_ref[0] += sq

    @pl.when(jnp.logical_and(i < sc_post, post_blk < s_post))
    def _post():
        p = p_ref[...].astype(jnp.float32)
        if post_rows % br_post != 0:
            row = lax.broadcasted_iota(jnp.int32, p.shape, 0) + post_blk * br_post
            p = jnp.where(row < post_rows, p, 0.0)
        if br_post % 8 == 0 and br_post > 8:
            p = jnp.sum(p.reshape(br_post // 8, 8, _LANE), axis=0)
        kl_out_ref[0] += p


def _fused_sums(rec2d, tgt2d, post2d):
    rec_rows = rec2d.shape[0]
    post_rows = post2d.shape[0]
    br_rec, s_rec, sc_rec = _plan(rec_rows)
    br_post, s_post, sc_post = _plan(post_rows)
    n_inner = max(sc_rec, sc_post)

    acc_rec = _acc_rows(br_rec)
    acc_post = _acc_rows(br_post)

    kernel = functools.partial(
        _ae_loss_kernel,
        rec_rows=rec_rows, post_rows=post_rows,
        br_rec=br_rec, br_post=br_post,
        s_rec=s_rec, s_post=s_post,
        sc_rec=sc_rec, sc_post=sc_post)

    # Clamped index maps: steps past a stream's end re-map to its last block
    # (redundant DMA at worst) and are gated off inside the kernel.
    def rec_idx(c, i):
        return (jnp.minimum(c * sc_rec + i, s_rec - 1), 0)

    def post_idx(c, i):
        return (jnp.minimum(c * sc_post + i, s_post - 1), 0)

    # Deeper pipelining for the two big streams only on v7x, where the
    # per-step DMA window is shortest (VMEM headroom exists now that the
    # accumulators are vreg-sized).
    big_pipe = dict(pipeline_mode=pl.Buffered(3)) if _NUM_CORES > 1 else {}

    in_specs = [
        pl.BlockSpec((br_rec, _LANE), rec_idx, **big_pipe),
        pl.BlockSpec((br_rec, _LANE), rec_idx, **big_pipe),
        pl.BlockSpec((br_post, _LANE), post_idx),
    ]
    out_specs = [
        pl.BlockSpec((1, acc_rec, _LANE), lambda c, i: (c, 0, 0)),
        pl.BlockSpec((1, acc_post, _LANE), lambda c, i: (c, 0, 0)),
    ]

    if _NUM_CORES > 1:
        # Actually shard the leading axis across the two v7x TensorCores.
        dim_sem = (pltpu.CORE_PARALLEL, pltpu.ARBITRARY)
    else:
        dim_sem = ("arbitrary", "arbitrary")

    bytes_accessed = (rec2d.size * rec2d.dtype.itemsize
                      + tgt2d.size * tgt2d.dtype.itemsize
                      + post2d.size * post2d.dtype.itemsize
                      + 4 * _NUM_CORES * (acc_rec + acc_post) * _LANE)
    cost = pl.CostEstimate(flops=3 * rec2d.size + post2d.size,
                           transcendentals=0,
                           bytes_accessed=bytes_accessed)

    rec_part, kl_part = pl.pallas_call(
        kernel,
        out_shape=(jax.ShapeDtypeStruct((_NUM_CORES, acc_rec, _LANE), jnp.float32),
                   jax.ShapeDtypeStruct((_NUM_CORES, acc_post, _LANE), jnp.float32)),
        grid_spec=pltpu.PrefetchScalarGridSpec(
            num_scalar_prefetch=0,
            grid=(_NUM_CORES, n_inner),
            in_specs=in_specs,
            out_specs=out_specs),
        compiler_params=pltpu.CompilerParams(
            dimension_semantics=dim_sem,
            vmem_limit_bytes=32 * 1024 * 1024),
        cost_estimate=cost,
    )(rec2d, tgt2d, post2d)

    # Tiny lane-dense partials; this reduce fuses with the final divide.
    return jnp.sum(rec_part), jnp.sum(kl_part)


@functools.partial(jax.jit, static_argnames=("is_kl",))
def ae_loss(reconstructions, targets, posteriors, is_kl=True):
    """Pallas implementation of AELoss.forward with an MSE pixel criterion.

    Inputs may be f32/bf16/f16; they are cast to f32 on the VPU inside the
    kernel -- do NOT pre-cast low-precision inputs (doubles HBM traffic).
    """
    # TODO(synk): is_kl=False requires posteriors.kl() (a DiagonalGaussian
    # object method); only the is_kl=True tensor path is implemented.
    assert is_kl, "only is_kl=True (posteriors already a KL tensor) supported"
    assert reconstructions.shape == targets.shape

    rec2d, rec_tail = _split_lane_rows(reconstructions)
    tgt2d, tgt_tail = _split_lane_rows(targets)
    post2d, post_tail = _split_lane_rows(posteriors)

    # Degenerate tiny streams (< 128 elements): feed a zero dummy block and
    # let the wrapper-side tail sums carry all the data.
    if rec2d.shape[0] == 0:
        rec2d = jnp.zeros((8, _LANE), reconstructions.dtype)
        tgt2d = jnp.zeros((8, _LANE), targets.dtype)
    if post2d.shape[0] == 0:
        post2d = jnp.zeros((8, _LANE), posteriors.dtype)

    rec_sum, kl_sum = _fused_sums(rec2d, tgt2d, post2d)

    # <128-element tails (only when numel % 128 != 0): trivial XLA reduces,
    # far cheaper than a host-side pad copy of the full stream.
    if rec_tail.shape[0]:
        d = rec_tail.astype(jnp.float32) - tgt_tail.astype(jnp.float32)
        rec_sum = rec_sum + jnp.sum(d * d)
    if post_tail.shape[0]:
        kl_sum = kl_sum + jnp.sum(post_tail.astype(jnp.float32))

    rec_loss = rec_sum / jnp.float32(reconstructions.shape[0])
    kl_loss = kl_sum / jnp.float32(posteriors.shape[0])
    return rec_loss, kl_loss


if __name__ == "__main__":
    key = jax.random.PRNGKey(0)
    k1, k2, k3, k4, k5, k6, k7, k8 = jax.random.split(key, 8)

    # --- Test 1: small NCHW inputs (single block per stream) ---------------
    recon = jax.random.normal(k1, (2, 4, 16, 16), dtype=jnp.float32)
    target = jax.random.normal(k2, (2, 4, 16, 16), dtype=jnp.float32)
    posterior_kl = jax.random.normal(k3, (2, 4, 4, 4), dtype=jnp.float32) ** 2

    rec_loss, kl_loss = ae_loss(recon, target, posterior_kl, is_kl=True)
    jax.block_until_ready((rec_loss, kl_loss))

    ref_rec = jnp.sum((recon - target) ** 2) / recon.shape[0]
    ref_kl = jnp.sum(posterior_kl) / posterior_kl.shape[0]
    assert jnp.allclose(rec_loss, ref_rec, rtol=1e-5, atol=1e-5), (rec_loss, ref_rec)
    assert jnp.allclose(kl_loss, ref_kl, rtol=1e-5, atol=1e-5), (kl_loss, ref_kl)

    # --- Test 2: multi-block path + masked partial last block + post tail --
    # 2*4*184*184 = 270848 elems -> 2116 lane-rows -> two blocks, masked tail
    # rows in the second; posterior has 4232 elems -> 33 rows + 8-elem tail
    # (exercises the no-pad tail path and the non-multiple-of-8 accumulator).
    recon2 = jax.random.normal(k4, (2, 4, 184, 184), dtype=jnp.float32)
    target2 = jax.random.normal(k5, (2, 4, 184, 184), dtype=jnp.float32)
    posterior2 = jax.random.normal(k6, (2, 4, 23, 23), dtype=jnp.float32) ** 2

    rec_loss2, kl_loss2 = ae_loss(recon2, target2, posterior2, is_kl=True)
    jax.block_until_ready((rec_loss2, kl_loss2))

    ref_rec2 = jnp.sum((recon2 - target2) ** 2) / recon2.shape[0]
    ref_kl2 = jnp.sum(posterior2) / posterior2.shape[0]
    assert jnp.allclose(rec_loss2, ref_rec2, rtol=1e-4, atol=1e-3), (rec_loss2, ref_rec2)
    assert jnp.allclose(kl_loss2, ref_kl2, rtol=1e-4, atol=1e-3), (kl_loss2, ref_kl2)

    # --- Test 3: non-128-aligned rec/tgt (wrapper tail path, tiny blocks) ---
    recon3 = jax.random.normal(k7, (2, 3, 17, 17), dtype=jnp.float32)
    target3 = jax.random.normal(k8, (2, 3, 17, 17), dtype=jnp.float32)
    posterior3 = posterior_kl

    rec_loss3, kl_loss3 = ae_loss(recon3, target3, posterior3, is_kl=True)
    jax.block_until_ready((rec_loss3, kl_loss3))

    ref_rec3 = jnp.sum((recon3 - target3) ** 2) / recon3.shape[0]
    ref_kl3 = jnp.sum(posterior3) / posterior3.shape[0]
    assert jnp.allclose(rec_loss3, ref_rec3, rtol=1e-5, atol=1e-5), (rec_loss3, ref_rec3)
    assert jnp.allclose(kl_loss3, ref_kl3, rtol=1e-5, atol=1e-5), (kl_loss3, ref_kl3)

    print("KERNEL_OK")
</pallas_src>

<mosaic_0001>
module attributes {stable_mosaic.version = 11 : i64} {
  func.func @_ae_loss_kernel(%arg0: i32, %arg1: i32, %arg2: memref<16x128xf32, #tpu.memory_space<vmem>>, %arg3: memref<16x128xf32, #tpu.memory_space<vmem>>, %arg4: memref<1x128xf32, #tpu.memory_space<vmem>>, %arg5: memref<1x8x128xf32, #tpu.memory_space<vmem>>, %arg6: memref<1x1x128xf32, #tpu.memory_space<vmem>>) attributes {dimension_semantics = [#tpu.dimension_semantics<arbitrary>, #tpu.dimension_semantics<arbitrary>], iteration_bounds = array<i64: 1, 1>, scalar_prefetch = 0 : i64, scratch_operands = 0 : i64, tpu.core_type = #tpu.core_type<tc>, window_params = [{transform_indices = @transform_0, window_bounds = array<i64: 16, 128>}, {transform_indices = @transform_1, window_bounds = array<i64: 16, 128>}, {transform_indices = @transform_2, window_bounds = array<i64: 1, 128>}, {transform_indices = @transform_3, window_bounds = array<i64: 1, 8, 128>}, {transform_indices = @transform_4, window_bounds = array<i64: 1, 1, 128>}]} {
    %c0_i32 = arith.constant 0 : i32
    %0 = arith.cmpi eq, %arg1, %c0_i32 : i32
    %1 = arith.extui %0 : i1 to i32
    %c0_i32_0 = arith.constant 0 : i32
    %2 = arith.cmpi ne, %1, %c0_i32_0 : i32
    scf.if %2 {
      %cst = arith.constant 0.000000e+00 : f32
      %17 = vector.broadcast %cst : f32 to vector<1x8x128xf32>
      %c0 = arith.constant 0 : index
      %c0_8 = arith.constant 0 : index
      %c0_9 = arith.constant 0 : index
      %18 = vector.load %arg5[%c0, %c0_8, %c0_9] : memref<1x8x128xf32, #tpu.memory_space<vmem>>, vector<1x8x128xf32>
      tpu.vector_store %arg5[%c0, %c0_8, %c0_9], %17 {strides = array<i32>} : memref<1x8x128xf32, #tpu.memory_space<vmem>>, vector<1x8x128xf32>,
      %cst_10 = arith.constant 0.000000e+00 : f32
      %19 = vector.broadcast %cst_10 : f32 to vector<1x1x128xf32>
      %c0_11 = arith.constant 0 : index
      %c0_12 = arith.constant 0 : index
      %c0_13 = arith.constant 0 : index
      %20 = vector.load %arg6[%c0_11, %c0_12, %c0_13] : memref<1x1x128xf32, #tpu.memory_space<vmem>>, vector<1x1x128xf32>
      tpu.vector_store %arg6[%c0_11, %c0_12, %c0_13], %19 {strides = array<i32>} : memref<1x1x128xf32, #tpu.memory_space<vmem>>, vector<1x1x128xf32>,
    } else {
    }
    %c1_i32 = arith.constant 1 : i32
    %3 = arith.muli %arg0, %c1_i32 : i32
    %4 = arith.addi %3, %arg1 : i32
    %c1_i32_1 = arith.constant 1 : i32
    %5 = arith.muli %arg0, %c1_i32_1 : i32
    %6 = arith.addi %5, %arg1 : i32
    %c1_i32_2 = arith.constant 1 : i32
    %7 = arith.cmpi slt, %arg1, %c1_i32_2 : i32
    %c1_i32_3 = arith.constant 1 : i32
    %8 = arith.cmpi slt, %4, %c1_i32_3 : i32
    %9 = arith.andi %7, %8 : i1
    %10 = arith.extui %9 : i1 to i32
    %c0_i32_4 = arith.constant 0 : i32
    %11 = arith.cmpi ne, %10, %c0_i32_4 : i32
    scf.if %11 {
      %c0 = arith.constant 0 : index
      %c0_8 = arith.constant 0 : index
      %17 = vector.load %arg2[%c0, %c0_8] : memref<16x128xf32, #tpu.memory_space<vmem>>, vector<16x128xf32>
      %c0_9 = arith.constant 0 : index
      %c0_10 = arith.constant 0 : index
      %18 = vector.load %arg3[%c0_9, %c0_10] : memref<16x128xf32, #tpu.memory_space<vmem>>, vector<16x128xf32>
      %19 = arith.subf %17, %18 : vector<16x128xf32>
      %20 = arith.mulf %19, %19 : vector<16x128xf32>
      %21 = vector.shape_cast %20 : vector<16x128xf32> to vector<2x8x128xf32>
      %cst = arith.constant dense<0.000000e+00> : vector<8x128xf32>
      %22 = vector.multi_reduction <add>, %21, %cst [0] : vector<2x8x128xf32> to vector<8x128xf32>
      %c0_11 = arith.constant 0 : index
      %c0_12 = arith.constant 0 : index
      %c0_13 = arith.constant 0 : index
      %23 = vector.load %arg5[%c0_11, %c0_12, %c0_13] : memref<1x8x128xf32, #tpu.memory_space<vmem>>, vector<1x8x128xf32>
      %24 = vector.shape_cast %23 : vector<1x8x128xf32> to vector<8x128xf32>
      %25 = arith.addf %24, %22 : vector<8x128xf32>
      %c0_14 = arith.constant 0 : index
      %c0_15 = arith.constant 0 : index
      %c0_16 = arith.constant 0 : index
      %26 = vector.load %arg5[%c0_14, %c0_15, %c0_16] : memref<1x8x128xf32, #tpu.memory_space<vmem>>, vector<1x8x128xf32>
      %27 = vector.shape_cast %26 : vector<1x8x128xf32> to vector<8x128xf32>
      %28 = vector.shape_cast %25 : vector<8x128xf32> to vector<1x8x128xf32>
      tpu.vector_store %arg5[%c0_14, %c0_15, %c0_16], %28 {strides = array<i32>} : memref<1x8x128xf32, #tpu.memory_space<vmem>>, vector<1x8x128xf32>,
    } else {
    }
    %c1_i32_5 = arith.constant 1 : i32
    %12 = arith.cmpi slt, %arg1, %c1_i32_5 : i32
    %c1_i32_6 = arith.constant 1 : i32
    %13 = arith.cmpi slt, %6, %c1_i32_6 : i32
    %14 = arith.andi %12, %13 : i1
    %15 = arith.extui %14 : i1 to i32
    %c0_i32_7 = arith.constant 0 : i32
    %16 = arith.cmpi ne, %15, %c0_i32_7 : i32
    scf.if %16 {
      %c0 = arith.constant 0 : index
      %c0_8 = arith.constant 0 : index
      %17 = vector.load %arg4[%c0, %c0_8] : memref<1x128xf32, #tpu.memory_space<vmem>>, vector<1x128xf32>
      %c0_9 = arith.constant 0 : index
      %c0_10 = arith.constant 0 : index
      %c0_11 = arith.constant 0 : index
      %18 = vector.load %arg6[%c0_9, %c0_10, %c0_11] : memref<1x1x128xf32, #tpu.memory_space<vmem>>, vector<1x1x128xf32>
      %19 = vector.shape_cast %18 : vector<1x1x128xf32> to vector<1x128xf32>
      %20 = arith.addf %19, %17 : vector<1x128xf32>
      %c0_12 = arith.constant 0 : index
      %c0_13 = arith.constant 0 : index
      %c0_14 = arith.constant 0 : index
      %21 = vector.load %arg6[%c0_12, %c0_13, %c0_14] : memref<1x1x128xf32, #tpu.memory_space<vmem>>, vector<1x1x128xf32>
      %22 = vector.shape_cast %21 : vector<1x1x128xf32> to vector<1x128xf32>
      %23 = vector.shape_cast %20 : vector<1x128xf32> to vector<1x1x128xf32>
      tpu.vector_store %arg6[%c0_12, %c0_13, %c0_14], %23 {strides = array<i32>} : memref<1x1x128xf32, #tpu.memory_space<vmem>>, vector<1x1x128xf32>,
    } else {
    }
    return
  }
  func.func @transform_0(%arg0: i32, %arg1: i32) -> (i32, i32) {
    %c1_i32 = arith.constant 1 : i32
    %0 = arith.muli %arg0, %c1_i32 : i32
    %1 = arith.addi %0, %arg1 : i32
    %c0_i32 = arith.constant 0 : i32
    %2 = arith.minsi %1, %c0_i32 : i32
    %c0_i32_0 = arith.constant 0 : i32
    %c0_i32_1 = arith.constant 0 : i32
    return %2, %c0_i32_0 : i32, i32
  }
  func.func @transform_1(%arg0: i32, %arg1: i32) -> (i32, i32) {
    %c1_i32 = arith.constant 1 : i32
    %0 = arith.muli %arg0, %c1_i32 : i32
    %1 = arith.addi %0, %arg1 : i32
    %c0_i32 = arith.constant 0 : i32
    %2 = arith.minsi %1, %c0_i32 : i32
    %c0_i32_0 = arith.constant 0 : i32
    %c0_i32_1 = arith.constant 0 : i32
    return %2, %c0_i32_0 : i32, i32
  }
  func.func @transform_2(%arg0: i32, %arg1: i32) -> (i32, i32) {
    %c1_i32 = arith.constant 1 : i32
    %0 = arith.muli %arg0, %c1_i32 : i32
    %1 = arith.addi %0, %arg1 : i32
    %c0_i32 = arith.constant 0 : i32
    %2 = arith.minsi %1, %c0_i32 : i32
    %c0_i32_0 = arith.constant 0 : i32
    %c0_i32_1 = arith.constant 0 : i32
    return %2, %c0_i32_0 : i32, i32
  }
  func.func @transform_3(%arg0: i32, %arg1: i32) -> (i32, i32, i32) {
    %c0_i32 = arith.constant 0 : i32
    %c0_i32_0 = arith.constant 0 : i32
    %c0_i32_1 = arith.constant 0 : i32
    return %arg0, %c0_i32, %c0_i32_0 : i32, i32, i32
  }
  func.func @transform_4(%arg0: i32, %arg1: i32) -> (i32, i32, i32) {
    %c0_i32 = arith.constant 0 : i32
    %c0_i32_0 = arith.constant 0 : i32
    %c0_i32_1 = arith.constant 0 : i32
    return %arg0, %c0_i32, %c0_i32_0 : i32, i32, i32
  }
}

</mosaic_0001>

<bundles_post_ra>
// kernel: ae_loss.1
= control target key start
LH: loop header
LB: loop body
LE: loop exit
PB: predicated region body
PF: predicated region fallthrough
CT: control target
= control target key end

     0   :  { %v157_v0 = vmov 0.0   ;;  %s210_s4 = inlined_call_operand.vmem [shape: f32[1,1,128], index: 4, kind: output, shape index: {1}]   ;;  %s211_s0 = inlined_call_operand.vmem [shape: f32[16,128], index: 0, kind: input, shape index: {}]   ;;  %s212_s1 = inlined_call_operand.vmem [shape: f32[16,128], index: 1, kind: input, shape index: {}]   ;;  %s213_s2 = inlined_call_operand.vmem [shape: f32[1,128], index: 2, kind: input, shape index: {}]   ;;  %s214_s3 = inlined_call_operand.vmem [shape: f32[1,8,128], index: 3, kind: output, shape index: {0}]  }
   0x1   :  { %109 = vst [vmem:[%s210_s4] sm:$0x1] %v157_v0  ;;  %v117_v1 = vld [vmem:[%s211_s0] sm:$0xff]  ;;  %v118_v2 = vld [vmem:[%s211_s0 + $0x8] sm:$0xff] }
   0x2   :  { %v119_v3 = vld [vmem:[%s212_s1] sm:$0xff]  ;;  %v120_v4 = vld [vmem:[%s212_s1 + $0x8] sm:$0xff] }
   0x3   :  { %v121_v5 = vsub.f32 %v117_v1, %v119_v3  ;;  %v122_v6 = vsub.f32 %v118_v2, %v120_v4  ;;  %v129_v9 = vld [vmem:[%s213_s2] sm:$0x1] }
   0x5   :  { %v123_v7 = vmul.f32 %v121_v5, %v121_v5  ;;  %v124_v8 = vmul.f32 %v122_v6, %v122_v6 }
   0x7   :  { %v125_v10 = vadd.f32 %v124_v8, %v123_v7 }
   0x8   :  { %v130_v11 = vld [vmem:[%s210_s4] sm:$0x1] }
   0x9   :  { %v131_v12 = vadd.f32 %v130_v11, %v129_v9  ;;  %128 = vst [vmem:[%s214_s3] sm:$0xff] %v125_v10 }
   0xb   :  { %132 = vst [vmem:[%s210_s4] sm:$0x1] %v131_v12 }

</bundles_post_ra>
